<compile_context>
chip_gen: v7x
topology: tpu7x:2x2x1
jax: 0.10.0
libtpu: 0.0.40
codegen_flags: <defaults>
</compile_context>

<pallas_src>
import functools

import jax
import jax.numpy as jnp
from jax import lax
from jax.experimental import pallas as pl
from jax.experimental.pallas import tpu as pltpu

EPS = 1e-12
_TILE_BYTES_BUDGET = 8 * 1024 * 1024  # f32 bytes per (1, TS, Hp) block


# ----------------------------------------------------------------------------- kernel
def _cln_kernel(h_true, x_ref, w_ref, b_ref, o_ref):
    # Per-grid-step views:
    #   x_ref : (1, TS, Hp)  one sequence tile of one batch element (zero-padded lanes)
    #   w_ref : (1, 1, Hp)   per-batch conditional scale (already includes gamma)
    #   b_ref : (1, 1, Hp)   per-batch conditional shift (already includes beta)
    x = x_ref[...].astype(jnp.float32)                     # (1, TS, Hp)
    w = w_ref[...].astype(jnp.float32)                     # (1, 1, Hp)
    b = b_ref[...].astype(jnp.float32)                     # (1, 1, Hp)

    inv_h = 1.0 / h_true
    # Single pass over x: sums are padding-invariant (pad lanes are zero), divide by the
    # true feature count.  var = E[x^2] - mean^2, clamped for cancellation safety.
    s1 = jnp.sum(x, axis=-1, keepdims=True)                # (1, TS, 1)
    s2 = jnp.sum(x * x, axis=-1, keepdims=True)            # (1, TS, 1)
    mean = s1 * inv_h
    var = jnp.maximum(s2 * inv_h - mean * mean, 0.0)
    inv_std = lax.rsqrt(var + EPS)                         # EUP, otherwise-idle slot

    # One fused sweep feeding the store (single vst pass; matters most on v5e's 1 vst slot).
    o_ref[...] = ((x - mean) * inv_std * w + b).astype(o_ref.dtype)


# ----------------------------------------------------------------------------- tiling
def _pick_seq_tile(S, align, max_rows):
    """Largest TS that is a multiple of `align`, divides S, and is <= max_rows.
    Falls back to S (single full block) if it fits the budget, else the largest aligned
    value <= max_rows (Pallas masks the ragged last block)."""
    max_rows = max(align, (max_rows // align) * align)
    best = 0
    ts = align
    limit = min(S, max_rows)
    while ts <= limit:
        if S % ts == 0:
            best = ts
        ts += align
    if best:
        return best
    return S if S <= max_rows else max_rows


def _adjust_for_occupancy(ts, S, B, align, min_steps=4):
    """Shrink TS (keeping alignment / divisibility) until B * ceil(S/TS) >= min_steps,
    so the ('parallel','parallel') megacore sharding keeps both v7x TCs busy."""
    while B * (-(-S // ts)) < min_steps and ts > align:
        cand = ((ts // 2) // align) * align
        if cand < align:
            break
        if S % ts == 0 and S % cand != 0:   # don't trade divisibility for occupancy
            break
        ts = cand
    return ts


def _vmem_limit_bytes(ts, hp, x_itemsize):
    """Tile-footprint-derived VMEM cap: 2x double-buffered in + out blocks, one f32
    temp block, the two param rows, plus 25% headroom.  Only override the 32 MiB
    scoped default when needed; never hand out all of v7x's 64 MiB physical VMEM."""
    blk_x = ts * hp * x_itemsize
    blk_f32 = ts * hp * 4
    params = 2 * 2 * hp * 4
    footprint = 2 * blk_x + 2 * blk_x + blk_f32 + params
    needed = int(footprint * 1.25)
    default = 32 * 1024 * 1024
    if needed <= default:
        return None
    return min(needed, 56 * 1024 * 1024)


# ----------------------------------------------------------------------------- wrapper
def pack_cond_weights(ww, wb):
    """Pack the two torch-Linear weights (H, 2H) once, outside the per-call path, into a
    single pre-transposed (2H, 2H) matrix so the projection is `cond @ wcat_t`."""
    return jnp.concatenate([ww, wb], axis=0).astype(jnp.float32).T


def conditional_layer_norm(x, cond, wcat_t, gamma, beta):
    """x: (B, S, H); cond: (B, 2H); wcat_t: (2H, 2H) from pack_cond_weights;
    gamma, beta: (H,)."""
    B, S, H = x.shape

    # ---- Hoisted conditional projection: one small XLA matmul (feeds the MXU) ----
    proj = jnp.dot(cond.astype(jnp.float32), wcat_t,
                   preferred_element_type=jnp.float32)                # (B, 2H)
    w_rows = proj[:, :H] + gamma.astype(jnp.float32)                  # (B, H)
    b_rows = proj[:, H:] + beta.astype(jnp.float32)                   # (B, H)

    # ---- Lane alignment: pad H to a multiple of 128 (stats stay exact, see kernel) ----
    Hp = ((H + 127) // 128) * 128
    if Hp != H:
        x_p = jnp.pad(x, ((0, 0), (0, 0), (0, Hp - H)))
        w_rows = jnp.pad(w_rows, ((0, 0), (0, Hp - H)))
        b_rows = jnp.pad(b_rows, ((0, 0), (0, Hp - H)))
    else:
        x_p = x
    w_rows = w_rows.reshape(B, 1, Hp)
    b_rows = b_rows.reshape(B, 1, Hp)

    # ---- Sequence tiling under a VMEM byte budget + megacore occupancy check ----
    itemsize = jnp.dtype(x.dtype).itemsize
    align = 16 if itemsize < 4 else 8            # bf16 packs 2 rows per sublane
    max_rows = max(align, _TILE_BYTES_BUDGET // (Hp * 4))
    TS = _pick_seq_tile(S, align, max_rows)
    TS = _adjust_for_occupancy(TS, S, B, align)
    grid = (B, pl.cdiv(S, TS))

    cp_kwargs = dict(dimension_semantics=("parallel", "parallel"))
    vmem_limit = _vmem_limit_bytes(TS, Hp, itemsize)
    if vmem_limit is not None:
        cp_kwargs["vmem_limit_bytes"] = vmem_limit

    out_p = pl.pallas_call(
        functools.partial(_cln_kernel, float(H)),
        out_shape=jax.ShapeDtypeStruct((B, S, Hp), x.dtype),
        grid_spec=pltpu.PrefetchScalarGridSpec(
            num_scalar_prefetch=0,
            grid=grid,
            in_specs=[
                pl.BlockSpec((1, TS, Hp), lambda bi, si: (bi, si, 0)),   # x tile
                pl.BlockSpec((1, 1, Hp), lambda bi, si: (bi, 0, 0)),     # per-batch scale
                pl.BlockSpec((1, 1, Hp), lambda bi, si: (bi, 0, 0)),     # per-batch shift
            ],
            out_specs=pl.BlockSpec((1, TS, Hp), lambda bi, si: (bi, si, 0)),
        ),
        compiler_params=pltpu.CompilerParams(**cp_kwargs),
    )(x_p, w_rows, b_rows)

    return out_p[:, :, :H] if Hp != H else out_p


# ----------------------------------------------------------------------------- reference
def _reference(x, cond, ww, wb, gamma, beta):
    # Pure-JAX mirror of the PyTorch forward.
    cond_e = cond[:, None, :]                              # (B, 1, 2H)
    w = jnp.einsum("bij,hj->bih", cond_e, ww) + gamma      # (B, 1, H)
    b = jnp.einsum("bij,hj->bih", cond_e, wb) + beta       # (B, 1, H)
    mean = jnp.mean(x, axis=-1, keepdims=True)
    out = x - mean
    var = jnp.mean(out ** 2, axis=-1, keepdims=True)
    std = jnp.sqrt(var + EPS)
    out = out / std
    return out * w + b


def _run_case(key, B, S, H):
    kx, kc, kw, kb = jax.random.split(key, 4)
    x = jax.random.normal(kx, (B, S, H), dtype=jnp.float32)
    cond = jax.random.normal(kc, (B, 2 * H), dtype=jnp.float32)
    # reset_weight_and_bias would zero the dense weights; use small non-trivial values
    # so the conditional path is actually exercised.
    ww = 0.01 * jax.random.normal(kw, (H, 2 * H), dtype=jnp.float32)   # weight_dense.weight
    wb = 0.01 * jax.random.normal(kb, (H, 2 * H), dtype=jnp.float32)   # bias_dense.weight
    gamma = jnp.ones((H,), dtype=jnp.float32)                          # self.weight
    beta = jnp.zeros((H,), dtype=jnp.float32)                          # self.bias

    wcat_t = pack_cond_weights(ww, wb)                                 # packed once
    out = conditional_layer_norm(x, cond, wcat_t, gamma, beta)
    out = jax.block_until_ready(out)

    ref = _reference(x, cond, ww, wb, gamma, beta)
    assert out.shape == (B, S, H)
    assert jnp.allclose(out, ref, atol=1e-5, rtol=1e-5), f"mismatch vs reference (B={B},S={S},H={H})"


if __name__ == "__main__":
    key = jax.random.PRNGKey(0)
    k1, k2 = jax.random.split(key)
    # Small primary case (exercises the lane-padded path: H=32 -> Hp=128).
    _run_case(k1, B=2, S=8, H=32)
    # Lane-aligned case (exercises the un-padded, lane-dense path).
    _run_case(k2, B=2, S=16, H=256)
    print("KERNEL_OK")
</pallas_src>

<mosaic_0001>
module attributes {stable_mosaic.version = 11 : i64} {
  func.func @_cln_kernel(%arg0: i32, %arg1: i32, %arg2: memref<1x8x128xf32, #tpu.memory_space<vmem>>, %arg3: memref<1x1x128xf32, #tpu.memory_space<vmem>>, %arg4: memref<1x1x128xf32, #tpu.memory_space<vmem>>, %arg5: memref<1x8x128xf32, #tpu.memory_space<vmem>>) attributes {dimension_semantics = [#tpu.dimension_semantics<parallel>, #tpu.dimension_semantics<parallel>], iteration_bounds = array<i64: 2, 1>, scalar_prefetch = 0 : i64, scratch_operands = 0 : i64, tpu.core_type = #tpu.core_type<tc>, window_params = [{transform_indices = @transform_0, window_bounds = array<i64: 1, 8, 128>}, {transform_indices = @transform_1, window_bounds = array<i64: 1, 1, 128>}, {transform_indices = @transform_2, window_bounds = array<i64: 1, 1, 128>}, {transform_indices = @transform_3, window_bounds = array<i64: 1, 8, 128>}]} {
    %c0 = arith.constant 0 : index
    %c0_0 = arith.constant 0 : index
    %c0_1 = arith.constant 0 : index
    %0 = vector.load %arg2[%c0, %c0_0, %c0_1] : memref<1x8x128xf32, #tpu.memory_space<vmem>>, vector<1x8x128xf32>
    %c0_2 = arith.constant 0 : index
    %c0_3 = arith.constant 0 : index
    %c0_4 = arith.constant 0 : index
    %1 = vector.load %arg3[%c0_2, %c0_3, %c0_4] : memref<1x1x128xf32, #tpu.memory_space<vmem>>, vector<1x1x128xf32>
    %c0_5 = arith.constant 0 : index
    %c0_6 = arith.constant 0 : index
    %c0_7 = arith.constant 0 : index
    %2 = vector.load %arg4[%c0_5, %c0_6, %c0_7] : memref<1x1x128xf32, #tpu.memory_space<vmem>>, vector<1x1x128xf32>
    %cst = arith.constant dense<0.000000e+00> : vector<1x8xf32>
    %3 = vector.multi_reduction <add>, %0, %cst [2] : vector<1x8x128xf32> to vector<1x8xf32>
    %4 = vector.shape_cast %3 : vector<1x8xf32> to vector<1x8x1xf32>
    %5 = arith.mulf %0, %0 : vector<1x8x128xf32>
    %cst_8 = arith.constant dense<0.000000e+00> : vector<1x8xf32>
    %6 = vector.multi_reduction <add>, %5, %cst_8 [2] : vector<1x8x128xf32> to vector<1x8xf32>
    %7 = vector.shape_cast %6 : vector<1x8xf32> to vector<1x8x1xf32>
    %cst_9 = arith.constant 3.125000e-02 : f32
    %8 = vector.broadcast %cst_9 : f32 to vector<1x8x1xf32>
    %9 = arith.mulf %4, %8 : vector<1x8x1xf32>
    %cst_10 = arith.constant 3.125000e-02 : f32
    %10 = vector.broadcast %cst_10 : f32 to vector<1x8x1xf32>
    %11 = arith.mulf %7, %10 : vector<1x8x1xf32>
    %12 = arith.mulf %9, %9 : vector<1x8x1xf32>
    %13 = arith.subf %11, %12 : vector<1x8x1xf32>
    %cst_11 = arith.constant 0.000000e+00 : f32
    %14 = vector.broadcast %cst_11 : f32 to vector<1x8x1xf32>
    %15 = arith.maximumf %13, %14 : vector<1x8x1xf32>
    %cst_12 = arith.constant 9.99999996E-13 : f32
    %16 = vector.broadcast %cst_12 : f32 to vector<1x8x1xf32>
    %17 = arith.addf %15, %16 : vector<1x8x1xf32>
    %18 = math.rsqrt %17 : vector<1x8x1xf32>
    %19 = vector.broadcast %9 : vector<1x8x1xf32> to vector<1x8x128xf32>
    %20 = arith.subf %0, %19 : vector<1x8x128xf32>
    %21 = vector.broadcast %18 : vector<1x8x1xf32> to vector<1x8x128xf32>
    %22 = arith.mulf %20, %21 : vector<1x8x128xf32>
    %23 = vector.broadcast %1 : vector<1x1x128xf32> to vector<1x8x128xf32>
    %24 = arith.mulf %22, %23 : vector<1x8x128xf32>
    %25 = vector.broadcast %2 : vector<1x1x128xf32> to vector<1x8x128xf32>
    %26 = arith.addf %24, %25 : vector<1x8x128xf32>
    %c0_13 = arith.constant 0 : index
    %c0_14 = arith.constant 0 : index
    %c0_15 = arith.constant 0 : index
    %27 = vector.load %arg5[%c0_13, %c0_14, %c0_15] : memref<1x8x128xf32, #tpu.memory_space<vmem>>, vector<1x8x128xf32>
    tpu.vector_store %arg5[%c0_13, %c0_14, %c0_15], %26 {strides = array<i32>} : memref<1x8x128xf32, #tpu.memory_space<vmem>>, vector<1x8x128xf32>,
    return
  }
  func.func @transform_0(%arg0: i32, %arg1: i32) -> (i32, i32, i32) {
    %c0_i32 = arith.constant 0 : i32
    %c0_i32_0 = arith.constant 0 : i32
    return %arg0, %arg1, %c0_i32 : i32, i32, i32
  }
  func.func @transform_1(%arg0: i32, %arg1: i32) -> (i32, i32, i32) {
    %c0_i32 = arith.constant 0 : i32
    %c0_i32_0 = arith.constant 0 : i32
    %c0_i32_1 = arith.constant 0 : i32
    return %arg0, %c0_i32, %c0_i32_0 : i32, i32, i32
  }
  func.func @transform_2(%arg0: i32, %arg1: i32) -> (i32, i32, i32) {
    %c0_i32 = arith.constant 0 : i32
    %c0_i32_0 = arith.constant 0 : i32
    %c0_i32_1 = arith.constant 0 : i32
    return %arg0, %c0_i32, %c0_i32_0 : i32, i32, i32
  }
  func.func @transform_3(%arg0: i32, %arg1: i32) -> (i32, i32, i32) {
    %c0_i32 = arith.constant 0 : i32
    %c0_i32_0 = arith.constant 0 : i32
    return %arg0, %arg1, %c0_i32 : i32, i32, i32
  }
}

</mosaic_0001>

<bundles_post_ra>
// kernel: tpu_custom_call.1
= control target key start
LH: loop header
LB: loop body
LE: loop exit
PB: predicated region body
PF: predicated region fallthrough
CT: control target
= control target key end

     0   :  { %8 = vsyncpa [#allocation3], 0  ;;  %s771_s0 = inlined_call_operand.hbm [shape: f32[2,8,128], index: 0, kind: input, shape index: {}]   ;;  %s772_s1 = inlined_call_operand.vmem [shape: f32[2,1,128], index: 1, kind: input, shape index: {}]   ;;  %s773_s2 = inlined_call_operand.vmem [shape: f32[2,1,128], index: 2, kind: input, shape index: {}]   ;;  %s774_s3 = inlined_call_operand.hbm [shape: f32[2,8,128], index: 3, kind: output, shape index: {}]  }
   0x1   :  { %10 = vsyncpa [#allocation3 + $0x1], 0 }
   0x2   :  { %11 = vsyncpa [#allocation4], 0 }
   0x3   :  { %13 = vsyncpa [#allocation4 + $0x1], 0  ;;  %s591_s12 = smov 0   ;;  %s593_s13 = smov 0  }
   0x4   :  { %s595_s14 = smov 0   ;;  %s597_s15 = smov 0  }
   0x5   :  { %s599_s16 = smov 0   ;;  %s601_s17 = smov 0  }
   0x6 LB: > { %s376_s18 = sadd.s32 4294967295, %s567_s17   ;;  %s377_s19 = sadd.s32 4294967294, %s567_s17   ;;  %s567_s17 = sphi %s601_s17, %s19_s17   ;;  %s563_s16 = sphi %s599_s16, %s790_s16   ;;  %s559_s15 = sphi %s597_s15, %s789_s15   ;;  %s555_s14 = sphi %s595_s14, %s788_s14   ;;  %s551_s13 = sphi %s593_s13, %s787_s13   ;;  %s547_s12 = sphi %s591_s12, %s786_s12  }
   0x7   : > { %s31_s20 = sadd.s32 1, %s563_s16  ;;  %s40_s21 = sadd.s32 1, %s555_s14 }
   0x8   : > { %p33_p0 = scmp.ge.s32.totalorder %s31_s20, 2  ;;  %p47_p1 = scmp.ne.s32.totalorder %s555_s14, %s551_s13 }
   0x9   : > { %p48_p2 = scmp.eq.s32.totalorder %s567_s17, 0  ;;  %p53_p3 = scmp.ne.s32.totalorder %s551_s13, %s547_s12 }
   0xa   : > { %s792_s20 = smov (%p33_p0, %s31_s20), 0  ;;  %p54_p5 = scmp.eq.s32.totalorder %s376_s18, 0 }
   0xb   : > { %p632_p4 = por %p48_p2, %p47_p1  ;;  %s35_s23 = ssub.s32 %s563_s16, %s792_s20 }
   0xc   : > { %p131_p6 = scmp.eq.s32.totalorder %s376_s18, 1  ;;  %p38_p7 = scmp.eq.s32.totalorder %s35_s23, 0 }
   0xd   : > { %p638_p8 = por %p54_p5, %p53_p3  ;;  %p137_p10 = scmp.eq.s32.totalorder %s377_s19, 1 }
   0xe   : > { %p642_p9 = por %p131_p6, %p47_p1  ;;  %p403_p13 = scmp.lt.s32.totalorder %s567_s17, 2 }
   0xf   : > { %s647_s26 = scalar_select %p38_p7, %s555_s14, %s40_s21  }
  0x10   : > { %s778_s25 = scalar_select %p642_p9, 1, 0 }
  0x11   : > { %p649_p11 = por %p137_p10, %p53_p3  ;;  %s157_s28 = sand.u32 1, %s555_s14  }
  0x12   : > { %s380_s29 = sshll.u32 %s157_s28, 3  ;;  %s381_s30 = sshll.u32 %s563_s16, 7 }
  0x13   : > { %s779_s27 = scalar_select %p649_p11, 1, 0 }
  0x14   : > { %s660_s6 = scalar_lea.hbm %s771_s0, %s381_s30  ;;  %s161_s7 = scalar_lea.vmem [#allocation2], %s380_s29 }
  0x15   : > { %s169_s8 = sshll.u32 %s161_s7, 4  ;;  %p666_p0 = pnand %p403_p13, %p632_p4  ;;  %s662_s8 = int_to_ptr.vmem [resolvable:$true] %s169_s8 }
  0x16   : > { %s158_s10 = scalar_lea.sflag [#allocation3], %s157_s28  ;;  %s455_s11 = scalar_lea.hbm %s660_s6, 128 }
  0x17   : > { %p456_p3 = scmp.ne.s32.totalorder %s660_s6, %s455_s11  ;;  %p457_p5 = pneg %p666_p0 }
  0x18   : > { %s460_s21 = scalar_lea.hbm %s771_s0, 256  ;;  %p461_p4 = scmp.lt.u32.totalorder %s660_s6, %s771_s0 }
  0x19   : > { %p458_p6 = pnand %p457_p5, %p456_p3  ;;  %p462_p10 = scmp.lt.u32.totalorder %s460_s21, %s455_s11 }
  0x1a   : > { %p464_p12 = scmp.lt.u32.totalorder %s455_s11, %s660_s6 }
  0x1b   : > { %p459_p7 = pneg %p458_p6  ;;  %p463_p13 = por %p462_p10, %p461_p4 }
  0x1d   : > { %p465_p1 = por %p464_p12, %p463_p13 }
  0x1f   : > { %p466_p2 = pnand %p465_p1, %p459_p7 }
  0x21   : > { %469 = shalt.err (!%p466_p2)
}
  0x22   : > { %s470_s28 = scalar_lea.vmem %s662_s8, 128  ;;  %s569_s29 = smov [#allocation2]  }
  0x23   : > { %p471_p3 = scmp.ne.s32.totalorder %s662_s8, %s470_s28  ;;  %s475_s30 = sshll.u32 %s569_s29, 4  ;;  %s476_s30 = int_to_ptr.vmem [resolvable:$false] %s475_s30 }
  0x24   : > { %s477_s4 = scalar_lea.vmem %s476_s30, 256  ;;  %p478_p9 = scmp.lt.s32.totalorder %s662_s8, %s476_s30 }
  0x25   : > { %p473_p6 = pnand %p471_p3, %p457_p5  ;;  %p479_p4 = scmp.lt.s32.totalorder %s477_s4, %s470_s28 }
  0x27   : > { %p474_p11 = pneg %p473_p6  ;;  %p480_p10 = por %p479_p4, %p478_p9 }
  0x29   : > { %p481_p12 = pnand %p480_p10, %p474_p11 }
  0x2b   : > { %484 = shalt.err (!%p481_p12)
}
  0x2c   : > { %398 = dma.hbm_to_vmem [thread:$0]  (!%p666_p0), %s660_s6, 128, %s662_s8, %s158_s10  }
  0x2d   : > { %p781_p1 = scmp.lt.s32.totalorder %s567_s17, 3  ;;  %p782_p2 = scmp.ge.s32.totalorder %s567_s17, 1 }
  0x2f   : > { %p187_p5 = pnand %p782_p2, %p781_p1 }
  0x30   : > { %s702_s5 = sand.u32 (!%p187_p5), 1, %s551_s13  }
  0x31   : > { %190 = sbr.rel (%p187_p5) target bundleno = 243 (0xf3), region = 32  ;;  %s383_s7 = sshll.u32 (!%p187_p5), %s702_s5, 3 }
  0x32   : > { %s193_s11 = scalar_lea.sflag (!%p187_p5), [#allocation3], %s702_s5  ;;  %s196_s18 = scalar_lea.vmem (!%p187_p5), [#allocation2], %s383_s7 }
  0x38   : > { %538 = dma.done.wait (%p638_p8), %s193_s11, 128  }
  0x39   : > { %540 = vsyncadd (%p638_p8), %s193_s11, 4294967168  ;;  %v231_v0 = vld [vmem:[%s196_s18] sm:$0xff]  ;;  %p225_p9 = scmp.lt.s32.totalorder %s559_s15, 1  ;;  %s388_s22 = sshll.u32 %s559_s15, 7 }
  0x3a   : > { %234 = vadd.xlane.f32.xlu0 %v231_v0  ;;  %v236_v1 = vmul.f32 %v231_v0, %v231_v0  ;;  %s224_s23 = scalar_lea.vmem [#allocation5], %s383_s7  ;;  %s722_s4 = scalar_lea.hbm %s774_s3, %s388_s22 }
  0x3b   : > { %s226_s6 = scalar_select %p225_p9, %s559_s15, 1 }
  0x3c   : > { %s278_s28 = sshll.u32 %s224_s23, 4  ;;  %s264_s11 = scalar_lea.sflag [#allocation4], %s702_s5  ;;  %s724_s28 = int_to_ptr.vmem [resolvable:$true] %s278_s28 }
  0x3d   : > { %s227_s9 = scalar_lea.vmem %s772_s1, %s226_s6  ;;  %s230_s21 = scalar_lea.vmem %s773_s2, %s226_s6 }
  0x3e   : > { %237 = vadd.xlane.f32.xlu0 %v236_v1  ;;  %v385_v12 = vld [vmem:[%s227_s9] ss:$0 sm:$0xff]  ;;  %s485_s18 = scalar_lea.vmem %s724_s28, 128  ;;  %p783_p11 = scmp.ne.s32.totalorder %s778_s25, 0 }
  0x3f   : > { %v386_v14 = vld [vmem:[%s230_s21] ss:$0 sm:$0xff]  ;;  %p486_p8 = scmp.ne.s32.totalorder %s724_s28, %s485_s18  ;;  %s570_s15 = smov [#allocation5]  }
  0x40   : > { %s489_s7 = sshll.u32 %s570_s15, 4  ;;  %s490_s7 = int_to_ptr.vmem [resolvable:$false] %s489_s7 }
  0x41   : > { %p487_p0 = pnand %p486_p8, %p783_p11  ;;  %s491_s6 = scalar_lea.vmem %s490_s7, 256 }
  0x42   : > { %p492_p13 = scmp.lt.s32.totalorder %s724_s28, %s490_s7  ;;  %p493_p3 = scmp.lt.s32.totalorder %s491_s6, %s485_s18 }
  0x43   : > { %p488_p7 = pneg %p487_p0 }
  0x44   : > { %p494_p6 = por %p493_p3, %p492_p13 }
  0x46   : > { %p495_p4 = pnand %p494_p6, %p488_p7 }
  0xc7   : > { %v235_v2 = vpop.xlane.xlu0 %234 }
  0xc8   : > { %v239_v3 = vmul.f32 0.03125, %v235_v2 }
  0xca   : > { %v241_v5 = vmul.f32 %v239_v3, %v239_v3  ;;  %v246_v10 = vsub.f32 %v231_v0, %v239_v3 }
  0xcb   : > { %v238_v4 = vpop.xlane.xlu0 %237 }
  0xcc   : > { %v240_v6 = vmul.f32 0.03125, %v238_v4 }
  0xce   : > { %v242_v7 = vsub.f32 %v240_v6, %v241_v5 }
  0xd0   : > { %v243_v8 = vmax.f32 %v242_v7, 0.0 }
  0xd2   : > { %v244_v9 = vadd.f32 1e-12, %v243_v8 }
  0xd4   : > { %453 = vrsqrt.f32 %v244_v9 }
  0xde   : > { %v454_v11 = vpop.eup %453 }
  0xdf   : > { %v247_v13 = vmul.f32 %v454_v11, %v246_v10 }
  0xe1   : > { %v254_v15 = vmul.f32 %v385_v12, %v247_v13 }
  0xe3   : > { %v261_v16 = vadd.f32 %v386_v14, %v254_v15 }
  0xe5   : > { %262 = vst [vmem:[%s224_s23] sm:$0xff] %v261_v16 }
  0xe6   : > { %498 = shalt.err (!%p495_p4)
}
  0xe7   : > { %s499_s5 = scalar_lea.hbm %s722_s4, 128  ;;  %s503_s9 = scalar_lea.hbm %s774_s3, 256 }
  0xe8   : > { %p500_p10 = scmp.ne.s32.totalorder %s722_s4, %s499_s5  ;;  %p504_p2 = scmp.lt.u32.totalorder %s722_s4, %s774_s3 }
  0xe9   : > { %p505_p5 = scmp.lt.u32.totalorder %s503_s9, %s499_s5  ;;  %p507_p8 = scmp.lt.u32.totalorder %s499_s5, %s722_s4 }
  0xea   : > { %p501_p12 = pnand %p500_p10, %p783_p11 }
  0xeb   : > { %p506_p9 = por %p505_p5, %p504_p2 }
  0xec   : > { %p502_p1 = pneg %p501_p12 }
  0xed   : > { %p508_p0 = por %p507_p8, %p506_p9 }
  0xef   : > { %p509_p7 = pnand %p508_p0, %p502_p1 }
  0xf1   : > { %512 = shalt.err (!%p509_p7)
}
  0xf2   : > { %393 = dma.vmem_to_hbm [thread:$0]  (%p783_p11), %s724_s28, 128, %s722_s4, %s264_s11  }
  0xf3 PF: > { %s290_s21 = sand.u32 1, %s547_s12   ;;  %p784_p13 = scmp.ne.s32.totalorder %s779_s27, 0 }
  0xf4   : > { %p785_p3 = scmp.ge.s32.totalorder %s567_s17, 2  ;;  %s291_s22 = scalar_lea.sflag [#allocation4], %s290_s21 }
  0xf6   : > { %p400_p6 = pnand %p785_p3, %p784_p13 }
  0xf8   : > { %542 = dma.done.wait (!%p400_p6), %s291_s22, 128  }
  0xf9   : > { %544 = vsyncadd (!%p400_p6), %s291_s22, 4294967168  ;;  %s19_s17 = sadd.s32 1, %s567_s17   ;;  %s786_s12 = smov %s551_s13 }
  0xfa   : > { %p16_p4 = scmp.ge.s32.totalorder %s19_s17, 4   ;;  %s787_s13 = smov %s555_s14 }
  0xfb   : > { %s788_s14 = smov %s647_s26  ;;  %s789_s15 = smov %s563_s16 }
  0xfc   : > { %s790_s16 = smov %s792_s20  ;;  %18 = sbr.rel (!%p16_p4) target bundleno = 6 (0x6), region = 83 }
 0x103   :  { %296 = vsyncpa [#allocation3], 1 }
 0x104   :  { %298 = vsyncpa [#allocation3 + $0x1], 1 }
 0x105   :  { %299 = vsyncpa [#allocation4], 1 }
 0x106   :  { %301 = vsyncpa [#allocation4 + $0x1], 1 }

</bundles_post_ra>
